<compile_context>
chip_gen: v6e
topology: v6e:2x2x1
jax: 0.10.0
libtpu: 0.0.40
codegen_flags: <defaults>
</compile_context>

<pallas_src>
import functools
import math
import re

import jax
import jax.numpy as jnp
from jax.experimental import pallas as pl
from jax.experimental.pallas import tpu as pltpu

LAYERS = [2, 4, 8, 16, 8, 4, 2]   # same default as the PyTorch module
TM_MAX = 4096                     # max packed rows per grid step
SUBLANES = 8                      # f32 sublane granularity


def _round_up(a, b):
    return (a + b - 1) // b * b


def _tpu_generation():
    """Best-effort TPU generation (5, 6, 7, ...).  Defaults to 6."""
    try:
        kind = jax.devices()[0].device_kind       # e.g. "TPU v5 lite", "TPU7x"
        m = re.search(r"(\d+)", kind)
        if m:
            return int(m.group(1))
    except Exception:
        pass
    return 6


# ----------------------------------------------------------------------------
# Parameter init (matches torch: xavier_uniform_ weights, default Linear bias)
# ----------------------------------------------------------------------------
def _xavier_uniform(key, fan_in, fan_out):
    a = math.sqrt(6.0 / (fan_in + fan_out))
    # torch Linear weight is (out, in); we keep (in, out) = W^T for h @ W^T
    return jax.random.uniform(key, (fan_in, fan_out), jnp.float32, -a, a)


def _linear_bias(key, fan_in, fan_out):
    bound = 1.0 / math.sqrt(fan_in)
    return jax.random.uniform(key, (fan_out,), jnp.float32, -bound, bound)


def init_params(key, layers=LAYERS):
    ws, bs = [], []
    prev = layers[0]
    for hsz in layers[1:]:
        key, kw, kb = jax.random.split(key, 3)
        ws.append(_xavier_uniform(kw, prev, hsz))
        bs.append(_linear_bias(kb, prev, hsz))
        prev = hsz
    return ws, bs


# ----------------------------------------------------------------------------
# Block-diagonal weight packing (host-side, pure JAX, done once)
# ----------------------------------------------------------------------------
def _pack_params(ws, bs, slot, groups):
    """Pack weights so `groups` samples share one `groups*slot`-lane row.

    first : (groups*d_in0, lanes)      dense-packed input rows -> slot layout
    middle: (L-2, lanes, lanes)        block-diagonal, slot -> slot
    last  : (lanes, groups*d_outL)     slot layout -> dense-packed output rows
    """
    L = len(ws)
    d_in0, d_out0 = ws[0].shape
    d_inL, d_outL = ws[-1].shape
    lanes = groups * slot

    w_first = jnp.zeros((groups * d_in0, lanes), jnp.float32)
    b_first = jnp.zeros((1, lanes), jnp.float32)
    for g in range(groups):
        w_first = w_first.at[g * d_in0:(g + 1) * d_in0,
                             g * slot:g * slot + d_out0].set(ws[0])
        b_first = b_first.at[0, g * slot:g * slot + d_out0].set(bs[0])

    n_mid = L - 2
    w_mid = jnp.zeros((n_mid, lanes, lanes), jnp.float32)
    b_mid = jnp.zeros((n_mid, 1, lanes), jnp.float32)
    for k in range(1, L - 1):
        fi, fo = ws[k].shape
        for g in range(groups):
            w_mid = w_mid.at[k - 1, g * slot:g * slot + fi,
                             g * slot:g * slot + fo].set(ws[k])
            b_mid = b_mid.at[k - 1, 0, g * slot:g * slot + fo].set(bs[k])

    w_last = jnp.zeros((lanes, groups * d_outL), jnp.float32)
    b_last = jnp.zeros((1, groups * d_outL), jnp.float32)
    for g in range(groups):
        w_last = w_last.at[g * slot:g * slot + d_inL,
                           g * d_outL:(g + 1) * d_outL].set(ws[-1])
        b_last = b_last.at[0, g * d_outL:(g + 1) * d_outL].set(bs[-1])

    return w_first, b_first, w_mid, b_mid, w_last, b_last


# ----------------------------------------------------------------------------
# Kernel: whole MLP chain fused, one row-tile per grid step
# ----------------------------------------------------------------------------
def _mlp_kernel(n_mid, x_ref, w0_ref, b0_ref, wm_ref, bm_ref, wl_ref, bl_ref,
                o_ref):
    # x_ref: (tm, groups*d_in) dense-packed rows (`groups` samples per row)
    h = x_ref[...]
    # first layer: dense-packed input -> slot layout
    h = jnp.dot(h, w0_ref[...], preferred_element_type=jnp.float32)
    h = jnp.maximum(h + b0_ref[...], 0.0)
    # middle layers: block-diagonal lanes x lanes (groups samples per MXU pass)
    for k in range(n_mid):
        h = jnp.dot(h, wm_ref[k], preferred_element_type=jnp.float32)
        h = jnp.maximum(h + bm_ref[k], 0.0)
    # last layer (no activation): slot layout -> dense-packed output
    h = jnp.dot(h, wl_ref[...], preferred_element_type=jnp.float32)
    o_ref[...] = (h + bl_ref[...]).astype(o_ref.dtype)


def np_mlp_pallas(x, ws, bs, *, tm_max=TM_MAX):
    """x: (B, N, D) float32.  Returns (B, N, layers[-1])."""
    B, N, D = x.shape
    L = len(ws)
    assert L >= 3, "packing below assumes >= 3 linear layers (default has 6)"
    assert ws[0].shape[0] == D
    out_dim = ws[-1].shape[1]

    gen = _tpu_generation()
    lanes = 256 if gen >= 6 else 128     # v6e/v7x: 2x256x256 MXU; v5e: 128x128
    num_tc = 2 if gen >= 7 else 1        # v7x has 2 TensorCores per chip

    dims = [D] + [w.shape[1] for w in ws]
    slot = max(8, pl.next_power_of_2(max(dims)))   # per-sample feature slot
    assert slot <= lanes and lanes % slot == 0
    groups = lanes // slot                          # samples per packed row

    M = B * N
    Mg = pl.cdiv(M, groups)                         # packed rows needed

    # Balanced row tiling; on v7x force an even (>=2) number of grid steps so
    # the "parallel" row axis shards across both TensorCores.
    steps = pl.cdiv(Mg, tm_max)
    if num_tc > 1 and Mg >= num_tc * SUBLANES:
        steps = _round_up(max(steps, num_tc), num_tc)
    tm = _round_up(pl.cdiv(Mg, steps), SUBLANES)    # rows per grid step
    Mp = steps * tm                                 # padded packed rows
    grid = (steps,)
    n_mid = L - 2

    # Dense-packed input: `groups` samples x D features per row (no lane pad).
    # Pure reshape when aligned; tail-only pad otherwise.
    x_flat = x.reshape(M, D).astype(jnp.float32)
    pad_rows = Mp * groups - M
    if pad_rows:
        x_flat = jnp.pad(x_flat, ((0, pad_rows), (0, 0)))
    x_pack = x_flat.reshape(Mp, groups * D)

    w0, b0, wm, bm, wl, bl = _pack_params(ws, bs, slot, groups)

    kernel = functools.partial(_mlp_kernel, n_mid)

    # Leave VMEM headroom: v7x has 64 MiB physical per TC, v5e/v6e 128 MiB.
    vmem_limit = (48 << 20) if gen >= 7 else (100 << 20)

    out_pack = pl.pallas_call(
        kernel,
        out_shape=jax.ShapeDtypeStruct((Mp, groups * out_dim), jnp.float32),
        grid_spec=pltpu.PrefetchScalarGridSpec(
            num_scalar_prefetch=0,
            grid=grid,
            in_specs=[
                pl.BlockSpec((tm, groups * D), lambda i: (i, 0)),
                pl.BlockSpec((groups * D, lanes), lambda i: (0, 0)),
                pl.BlockSpec((1, lanes), lambda i: (0, 0)),
                pl.BlockSpec((n_mid, lanes, lanes), lambda i: (0, 0, 0)),
                pl.BlockSpec((n_mid, 1, lanes), lambda i: (0, 0, 0)),
                pl.BlockSpec((lanes, groups * out_dim), lambda i: (0, 0)),
                pl.BlockSpec((1, groups * out_dim), lambda i: (0, 0)),
            ],
            out_specs=pl.BlockSpec((tm, groups * out_dim), lambda i: (i, 0)),
        ),
        compiler_params=pltpu.CompilerParams(
            dimension_semantics=("parallel",),
            vmem_limit_bytes=vmem_limit),
    )(x_pack, w0, b0, wm, bm, wl, bl)

    out = out_pack.reshape(Mp * groups, out_dim)[:M]
    return out.reshape(B, N, out_dim)


# ----------------------------------------------------------------------------
# Pure-JAX reference
# ----------------------------------------------------------------------------
def np_mlp_reference(x, ws, bs):
    B, N, D = x.shape
    h = x.reshape(-1, D).astype(jnp.float32)
    for i, (w, b) in enumerate(zip(ws, bs)):
        h = h @ w + b
        if i < len(ws) - 1:
            h = jnp.maximum(h, 0.0)
    return h.reshape(B, N, -1)


if __name__ == "__main__":
    key = jax.random.PRNGKey(0)
    k_param, k_x = jax.random.split(key)

    ws, bs = init_params(k_param, LAYERS)

    B, N, D = 2, 8, LAYERS[0]
    x = jax.random.normal(k_x, (B, N, D), jnp.float32)

    out = np_mlp_pallas(x, ws, bs)
    out = jax.block_until_ready(out)

    ref = np_mlp_reference(x, ws, bs)
    assert out.shape == (B, N, LAYERS[-1]), out.shape
    assert jnp.allclose(out, ref, atol=1e-5, rtol=1e-5), (
        float(jnp.max(jnp.abs(out - ref))))

    print("KERNEL_OK")
</pallas_src>

<mosaic_0001>
module attributes {stable_mosaic.version = 11 : i64} {
  func.func @_mlp_kernel(%arg0: i32, %arg1: memref<8x32xf32, #tpu.memory_space<vmem>>, %arg2: memref<32x256xf32, #tpu.memory_space<vmem>>, %arg3: memref<1x256xf32, #tpu.memory_space<vmem>>, %arg4: memref<4x256x256xf32, #tpu.memory_space<vmem>>, %arg5: memref<4x1x256xf32, #tpu.memory_space<vmem>>, %arg6: memref<256x32xf32, #tpu.memory_space<vmem>>, %arg7: memref<1x32xf32, #tpu.memory_space<vmem>>, %arg8: memref<8x32xf32, #tpu.memory_space<vmem>>) attributes {dimension_semantics = [#tpu.dimension_semantics<parallel>], iteration_bounds = array<i64: 1>, scalar_prefetch = 0 : i64, scratch_operands = 0 : i64, tpu.core_type = #tpu.core_type<tc>, window_params = [{transform_indices = @transform_0, window_bounds = array<i64: 8, 32>}, {pipeline_mode = #tpu.pipeline_mode<synchronous>, transform_indices = @transform_1, window_bounds = array<i64: 32, 256>}, {pipeline_mode = #tpu.pipeline_mode<synchronous>, transform_indices = @transform_2, window_bounds = array<i64: 1, 256>}, {pipeline_mode = #tpu.pipeline_mode<synchronous>, transform_indices = @transform_3, window_bounds = array<i64: 4, 256, 256>}, {pipeline_mode = #tpu.pipeline_mode<synchronous>, transform_indices = @transform_4, window_bounds = array<i64: 4, 1, 256>}, {pipeline_mode = #tpu.pipeline_mode<synchronous>, transform_indices = @transform_5, window_bounds = array<i64: 256, 32>}, {pipeline_mode = #tpu.pipeline_mode<synchronous>, transform_indices = @transform_6, window_bounds = array<i64: 1, 32>}, {transform_indices = @transform_7, window_bounds = array<i64: 8, 32>}]} {
    %c0 = arith.constant 0 : index
    %c0_0 = arith.constant 0 : index
    %0 = vector.load %arg1[%c0, %c0_0] : memref<8x32xf32, #tpu.memory_space<vmem>>, vector<8x32xf32>
    %c0_1 = arith.constant 0 : index
    %c0_2 = arith.constant 0 : index
    %1 = vector.load %arg2[%c0_1, %c0_2] : memref<32x256xf32, #tpu.memory_space<vmem>>, vector<32x256xf32>
    %cst = arith.constant dense<0.000000e+00> : vector<8x256xf32>
    %2 = tpu.matmul %0, %1, %cst {dimension_numbers = #tpu.dot_dimension_numbers<[1], [0], [0], [1], [0, 0, 1, 1], [], []>} : vector<8x32xf32>, vector<32x256xf32>, vector<8x256xf32> -> vector<8x256xf32>
    %c0_3 = arith.constant 0 : index
    %c0_4 = arith.constant 0 : index
    %3 = vector.load %arg3[%c0_3, %c0_4] : memref<1x256xf32, #tpu.memory_space<vmem>>, vector<1x256xf32>
    %4 = vector.broadcast %3 : vector<1x256xf32> to vector<8x256xf32>
    %5 = arith.addf %2, %4 : vector<8x256xf32>
    %cst_5 = arith.constant 0.000000e+00 : f32
    %6 = vector.broadcast %cst_5 : f32 to vector<8x256xf32>
    %7 = arith.maximumf %5, %6 : vector<8x256xf32>
    %c0_6 = arith.constant 0 : index
    %c0_7 = arith.constant 0 : index
    %c0_8 = arith.constant 0 : index
    %8 = vector.load %arg4[%c0_6, %c0_7, %c0_8] : memref<4x256x256xf32, #tpu.memory_space<vmem>>, vector<1x256x256xf32>
    %9 = vector.shape_cast %8 : vector<1x256x256xf32> to vector<256x256xf32>
    %cst_9 = arith.constant dense<0.000000e+00> : vector<8x256xf32>
    %10 = tpu.matmul %7, %9, %cst_9 {dimension_numbers = #tpu.dot_dimension_numbers<[1], [0], [0], [1], [0, 0, 1, 1], [], []>} : vector<8x256xf32>, vector<256x256xf32>, vector<8x256xf32> -> vector<8x256xf32>
    %c0_10 = arith.constant 0 : index
    %c0_11 = arith.constant 0 : index
    %c0_12 = arith.constant 0 : index
    %11 = vector.load %arg5[%c0_10, %c0_11, %c0_12] : memref<4x1x256xf32, #tpu.memory_space<vmem>>, vector<1x1x256xf32>
    %12 = vector.shape_cast %11 : vector<1x1x256xf32> to vector<1x256xf32>
    %13 = vector.broadcast %12 : vector<1x256xf32> to vector<8x256xf32>
    %14 = arith.addf %10, %13 : vector<8x256xf32>
    %cst_13 = arith.constant 0.000000e+00 : f32
    %15 = vector.broadcast %cst_13 : f32 to vector<8x256xf32>
    %16 = arith.maximumf %14, %15 : vector<8x256xf32>
    %c1 = arith.constant 1 : index
    %c0_14 = arith.constant 0 : index
    %c0_15 = arith.constant 0 : index
    %17 = vector.load %arg4[%c1, %c0_14, %c0_15] : memref<4x256x256xf32, #tpu.memory_space<vmem>>, vector<1x256x256xf32>
    %18 = vector.shape_cast %17 : vector<1x256x256xf32> to vector<256x256xf32>
    %cst_16 = arith.constant dense<0.000000e+00> : vector<8x256xf32>
    %19 = tpu.matmul %16, %18, %cst_16 {dimension_numbers = #tpu.dot_dimension_numbers<[1], [0], [0], [1], [0, 0, 1, 1], [], []>} : vector<8x256xf32>, vector<256x256xf32>, vector<8x256xf32> -> vector<8x256xf32>
    %c1_17 = arith.constant 1 : index
    %c0_18 = arith.constant 0 : index
    %c0_19 = arith.constant 0 : index
    %20 = vector.load %arg5[%c1_17, %c0_18, %c0_19] : memref<4x1x256xf32, #tpu.memory_space<vmem>>, vector<1x1x256xf32>
    %21 = vector.shape_cast %20 : vector<1x1x256xf32> to vector<1x256xf32>
    %22 = vector.broadcast %21 : vector<1x256xf32> to vector<8x256xf32>
    %23 = arith.addf %19, %22 : vector<8x256xf32>
    %cst_20 = arith.constant 0.000000e+00 : f32
    %24 = vector.broadcast %cst_20 : f32 to vector<8x256xf32>
    %25 = arith.maximumf %23, %24 : vector<8x256xf32>
    %c2 = arith.constant 2 : index
    %c0_21 = arith.constant 0 : index
    %c0_22 = arith.constant 0 : index
    %26 = vector.load %arg4[%c2, %c0_21, %c0_22] : memref<4x256x256xf32, #tpu.memory_space<vmem>>, vector<1x256x256xf32>
    %27 = vector.shape_cast %26 : vector<1x256x256xf32> to vector<256x256xf32>
    %cst_23 = arith.constant dense<0.000000e+00> : vector<8x256xf32>
    %28 = tpu.matmul %25, %27, %cst_23 {dimension_numbers = #tpu.dot_dimension_numbers<[1], [0], [0], [1], [0, 0, 1, 1], [], []>} : vector<8x256xf32>, vector<256x256xf32>, vector<8x256xf32> -> vector<8x256xf32>
    %c2_24 = arith.constant 2 : index
    %c0_25 = arith.constant 0 : index
    %c0_26 = arith.constant 0 : index
    %29 = vector.load %arg5[%c2_24, %c0_25, %c0_26] : memref<4x1x256xf32, #tpu.memory_space<vmem>>, vector<1x1x256xf32>
    %30 = vector.shape_cast %29 : vector<1x1x256xf32> to vector<1x256xf32>
    %31 = vector.broadcast %30 : vector<1x256xf32> to vector<8x256xf32>
    %32 = arith.addf %28, %31 : vector<8x256xf32>
    %cst_27 = arith.constant 0.000000e+00 : f32
    %33 = vector.broadcast %cst_27 : f32 to vector<8x256xf32>
    %34 = arith.maximumf %32, %33 : vector<8x256xf32>
    %c3 = arith.constant 3 : index
    %c0_28 = arith.constant 0 : index
    %c0_29 = arith.constant 0 : index
    %35 = vector.load %arg4[%c3, %c0_28, %c0_29] : memref<4x256x256xf32, #tpu.memory_space<vmem>>, vector<1x256x256xf32>
    %36 = vector.shape_cast %35 : vector<1x256x256xf32> to vector<256x256xf32>
    %cst_30 = arith.constant dense<0.000000e+00> : vector<8x256xf32>
    %37 = tpu.matmul %34, %36, %cst_30 {dimension_numbers = #tpu.dot_dimension_numbers<[1], [0], [0], [1], [0, 0, 1, 1], [], []>} : vector<8x256xf32>, vector<256x256xf32>, vector<8x256xf32> -> vector<8x256xf32>
    %c3_31 = arith.constant 3 : index
    %c0_32 = arith.constant 0 : index
    %c0_33 = arith.constant 0 : index
    %38 = vector.load %arg5[%c3_31, %c0_32, %c0_33] : memref<4x1x256xf32, #tpu.memory_space<vmem>>, vector<1x1x256xf32>
    %39 = vector.shape_cast %38 : vector<1x1x256xf32> to vector<1x256xf32>
    %40 = vector.broadcast %39 : vector<1x256xf32> to vector<8x256xf32>
    %41 = arith.addf %37, %40 : vector<8x256xf32>
    %cst_34 = arith.constant 0.000000e+00 : f32
    %42 = vector.broadcast %cst_34 : f32 to vector<8x256xf32>
    %43 = arith.maximumf %41, %42 : vector<8x256xf32>
    %c0_35 = arith.constant 0 : index
    %c0_36 = arith.constant 0 : index
    %44 = vector.load %arg6[%c0_35, %c0_36] : memref<256x32xf32, #tpu.memory_space<vmem>>, vector<256x32xf32>
    %cst_37 = arith.constant dense<0.000000e+00> : vector<8x32xf32>
    %45 = tpu.matmul %43, %44, %cst_37 {dimension_numbers = #tpu.dot_dimension_numbers<[1], [0], [0], [1], [0, 0, 1, 1], [], []>} : vector<8x256xf32>, vector<256x32xf32>, vector<8x32xf32> -> vector<8x32xf32>
    %c0_38 = arith.constant 0 : index
    %c0_39 = arith.constant 0 : index
    %46 = vector.load %arg7[%c0_38, %c0_39] : memref<1x32xf32, #tpu.memory_space<vmem>>, vector<1x32xf32>
    %47 = vector.broadcast %46 : vector<1x32xf32> to vector<8x32xf32>
    %48 = arith.addf %45, %47 : vector<8x32xf32>
    %c0_40 = arith.constant 0 : index
    %c0_41 = arith.constant 0 : index
    %49 = vector.load %arg8[%c0_40, %c0_41] : memref<8x32xf32, #tpu.memory_space<vmem>>, vector<8x32xf32>
    tpu.vector_store %arg8[%c0_40, %c0_41], %48 {strides = array<i32>} : memref<8x32xf32, #tpu.memory_space<vmem>>, vector<8x32xf32>,
    return
  }
  func.func @transform_0(%arg0: i32) -> (i32, i32) {
    %c0_i32 = arith.constant 0 : i32
    %c0_i32_0 = arith.constant 0 : i32
    return %arg0, %c0_i32 : i32, i32
  }
  func.func @transform_1(%arg0: i32) -> (i32, i32) {
    %c0_i32 = arith.constant 0 : i32
    %c0_i32_0 = arith.constant 0 : i32
    %c0_i32_1 = arith.constant 0 : i32
    return %c0_i32, %c0_i32_0 : i32, i32
  }
  func.func @transform_2(%arg0: i32) -> (i32, i32) {
    %c0_i32 = arith.constant 0 : i32
    %c0_i32_0 = arith.constant 0 : i32
    %c0_i32_1 = arith.constant 0 : i32
    return %c0_i32, %c0_i32_0 : i32, i32
  }
  func.func @transform_3(%arg0: i32) -> (i32, i32, i32) {
    %c0_i32 = arith.constant 0 : i32
    %c0_i32_0 = arith.constant 0 : i32
    %c0_i32_1 = arith.constant 0 : i32
    %c0_i32_2 = arith.constant 0 : i32
    return %c0_i32, %c0_i32_0, %c0_i32_1 : i32, i32, i32
  }
  func.func @transform_4(%arg0: i32) -> (i32, i32, i32) {
    %c0_i32 = arith.constant 0 : i32
    %c0_i32_0 = arith.constant 0 : i32
    %c0_i32_1 = arith.constant 0 : i32
    %c0_i32_2 = arith.constant 0 : i32
    return %c0_i32, %c0_i32_0, %c0_i32_1 : i32, i32, i32
  }
  func.func @transform_5(%arg0: i32) -> (i32, i32) {
    %c0_i32 = arith.constant 0 : i32
    %c0_i32_0 = arith.constant 0 : i32
    %c0_i32_1 = arith.constant 0 : i32
    return %c0_i32, %c0_i32_0 : i32, i32
  }
  func.func @transform_6(%arg0: i32) -> (i32, i32) {
    %c0_i32 = arith.constant 0 : i32
    %c0_i32_0 = arith.constant 0 : i32
    %c0_i32_1 = arith.constant 0 : i32
    return %c0_i32, %c0_i32_0 : i32, i32
  }
  func.func @transform_7(%arg0: i32) -> (i32, i32) {
    %c0_i32 = arith.constant 0 : i32
    %c0_i32_0 = arith.constant 0 : i32
    return %arg0, %c0_i32 : i32, i32
  }
}

</mosaic_0001>

<bundles_post_ra>
// kernel: tpu_custom_call.1
= control target key start
LH: loop header
LB: loop body
LE: loop exit
PB: predicated region body
PF: predicated region fallthrough
CT: control target
= control target key end

     0   :  { %12 = vsyncpa [#allocation3], 0  ;;  %s1163_s0 = inlined_call_operand.vmem [shape: f32[8,32], index: 0, kind: input, shape index: {}]   ;;  %s1164_s1 = inlined_call_operand.vmem [shape: f32[32,256], index: 1, kind: input, shape index: {}]   ;;  %s1165_s2 = inlined_call_operand.vmem [shape: f32[1,256], index: 2, kind: input, shape index: {}]   ;;  %s1166_s3 = inlined_call_operand.hbm [shape: f32[4,256,256], index: 3, kind: input, shape index: {}]   ;;  %s1167_s4 = inlined_call_operand.vmem [shape: f32[4,1,256], index: 4, kind: input, shape index: {}]   ;;  %s1168_s5 = inlined_call_operand.vmem [shape: f32[256,32], index: 5, kind: input, shape index: {}]   ;;  %s1169_s6 = inlined_call_operand.vmem [shape: f32[1,32], index: 6, kind: input, shape index: {}]   ;;  %s1170_s7 = inlined_call_operand.hbm [shape: f32[8,32], index: 7, kind: output, shape index: {}]  }
   0x1   :  { %13 = vsyncpa [#allocation4], 0  ;;  %s955_s24 = smov [#allocation2]  }
   0x2   :  { %s25_s25 = sshll.u32 %s955_s24, 4  ;;  %s26_s25 = int_to_ptr.vmem [resolvable:$true] %s25_s25 }
   0x3   :  { %s919_s26 = scalar_lea.vmem %s26_s25, 32768  ;;  %p924_p1 = scmp.lt.s32.totalorder %s26_s25, %s26_s25 }
   0x4   :  { %p920_p0 = scmp.ne.s32.totalorder %s26_s25, %s919_s26  ;;  %p925_p2 = scmp.lt.s32.totalorder %s919_s26, %s919_s26 }
   0x6   :  { %p926_p3 = por %p925_p2, %p924_p1 }
   0x8   :  { %p927_p4 = pnand %p926_p3, %p920_p0 }
   0xa   :  { %930 = shalt.err (!%p927_p4)
}
   0xb   :  { %s956_s27 = smov 256   ;;  %s957_s28 = smov 16  }
   0xc   :  { %31 = dma.hbm_to_vmem [thread:$0]  %s1166_s3, 32768, %s26_s25, [#allocation3], %s956_s27, %s956_s27, %s957_s28  }
   0xd   :  { %951 = dma.done.wait [#allocation3], 32768  }
   0xe   :  { %952 = vsyncadd [#allocation3], 4294934528  ;;  %v958_v0 = vmov 0.0   ;;  %v49_v1 = vld [vmem:[%s1164_s1 + $0x38] sm:$0xff]  ;;  %v48_v2 = vld [vmem:[%s1164_s1 + $0x30] sm:$0xff]  ;;  %vm62_vm0 = vcmask 261120  }
   0xf   :  { %130 = vmatprep.mubr.f32.mxu0 %v958_v0  ;;  %v47_v3 = vld [vmem:[%s1164_s1 + $0x28] sm:$0xff]  ;;  %90 = vmatprep.subr.mxu0 %v49_v1  ;;  %v46_v4 = vld [vmem:[%s1164_s1 + $0x20] sm:$0xff]  ;;  %v45_v5 = vld [vmem:[%s1164_s1 + $0x18] sm:$0xff]  ;;  %s959_s19 = smov [#allocation5]  }
  0x10   :  { %91 = vmatpush1.msra.mxu0 %v48_v2  ;;  %v44_v6 = vld [vmem:[%s1164_s1 + $0x10] sm:$0xff]  ;;  %v170_v7 = vld [vmem:[#allocation2 + $0xf8] sm:$0xff]  ;;  %v168_v9 = vld [vmem:[#allocation2 + $0xe8] sm:$0xff] }
  0x11   :  { %92 = vmatprep.subr.mxu0 %v47_v3  ;;  %v169_v8 = vld [vmem:[#allocation2 + $0xf0] sm:$0xff]  ;;  %v43_v10 = vld [vmem:[%s1164_s1 + $0x8] sm:$0xff]  ;;  %215 = vmatprep.subr.mxu1 %v170_v7  ;;  %v167_v11 = vld [vmem:[#allocation2 + $0xe0] sm:$0xff] }
  0x12   :  { %93 = vmatpush1.msra.mxu0 %v46_v4  ;;  %v42_v12 = vld [vmem:[%s1164_s1] sm:$0xff]  ;;  %216 = vmatpush1.msra.mxu1 %v169_v8  ;;  %v166_v13 = vld [vmem:[#allocation2 + $0xd8] sm:$0xff]  ;;  %v165_v15 = vld [vmem:[#allocation2 + $0xd0] sm:$0xff] }
  0x13   :  { %94 = vmatprep.subr.mxu0 %v45_v5  ;;  %v41_v14 = vld [vmem:[%s1163_s0] sm:$0xff]  ;;  %217 = vmatprep.subr.mxu1 %v168_v9  ;;  %v164_v16 = vld [vmem:[#allocation2 + $0xc8] sm:$0xff]  ;;  %v162_v18 = vld [vmem:[#allocation2 + $0xb8] sm:$0xff] }
  0x14   :  { %95 = vmatpush1.msra.mxu0 %v44_v6  ;;  %218 = vmatpush1.msra.mxu1 %v167_v11  ;;  %v163_v17 = vld [vmem:[#allocation2 + $0xc0] sm:$0xff]  ;;  %v161_v19 = vld [vmem:[#allocation2 + $0xb0] sm:$0xff]  ;;  %v160_v20 = vld [vmem:[#allocation2 + $0xa8] sm:$0xff] }
  0x15   :  { %96 = vmatprep.subr.mxu0 %v43_v10  ;;  %219 = vmatprep.subr.mxu1 %v166_v13  ;;  %v159_v21 = vld [vmem:[#allocation2 + $0xa0] sm:$0xff]  ;;  %v158_v22 = vld [vmem:[#allocation2 + $0x98] sm:$0xff]  ;;  %v157_v23 = vld [vmem:[#allocation2 + $0x90] sm:$0xff] }
  0x16   :  { %97 = vmatpush1.msra.mxu0 %v42_v12  ;;  %220 = vmatpush1.msra.mxu1 %v165_v15  ;;  %v156_v24 = vld [vmem:[#allocation2 + $0x88] sm:$0xff]  ;;  %v155_v25 = vld [vmem:[#allocation2 + $0x80] sm:$0xff]  ;;  %v154_v26 = vld [vmem:[#allocation2 + $0x78] sm:$0xff] }
  0x17   :  { %866 = vmatmul.mubr.msk.f32.vlgmr.msra.gmra.mxu0 %vm62_vm0, %v41_v14  ;;  %221 = vmatprep.subr.mxu1 %v164_v16  ;;  %v153_v27 = vld [vmem:[#allocation2 + $0x70] sm:$0xff]  ;;  %v152_v28 = vld [vmem:[#allocation2 + $0x68] sm:$0xff]  ;;  %v151_v29 = vld [vmem:[#allocation2 + $0x60] sm:$0xff] }
  0x18   :  { %222 = vmatpush1.msra.mxu1 %v163_v17  ;;  %v150_v30 = vld [vmem:[#allocation2 + $0x58] sm:$0xff]  ;;  %v149_v31 = vld [vmem:[#allocation2 + $0x50] sm:$0xff]  ;;  %v148_v32 = vld [vmem:[#allocation2 + $0x48] sm:$0xff] }
  0x19   :  { %223 = vmatprep.subr.mxu1 %v162_v18  ;;  %v147_v33 = vld [vmem:[#allocation2 + $0x40] sm:$0xff]  ;;  %v146_v34 = vld [vmem:[#allocation2 + $0x38] sm:$0xff]  ;;  %v145_v35 = vld [vmem:[#allocation2 + $0x30] sm:$0xff] }
  0x1a   :  { %224 = vmatpush1.msra.mxu1 %v161_v19  ;;  %v144_v36 = vld [vmem:[#allocation2 + $0x28] sm:$0xff]  ;;  %v143_v37 = vld [vmem:[#allocation2 + $0x20] sm:$0xff]  ;;  %v142_v38 = vld [vmem:[#allocation2 + $0x18] sm:$0xff] }
  0x1b   :  { %225 = vmatprep.subr.mxu1 %v160_v20  ;;  %v141_v39 = vld [vmem:[#allocation2 + $0x10] sm:$0xff]  ;;  %v140_v40 = vld [vmem:[#allocation2 + $0x8] sm:$0xff]  ;;  %v139_v41 = vld [vmem:[#allocation2] sm:$0xff] }
  0x1c   :  { %226 = vmatpush1.msra.mxu1 %v159_v21  ;;  %v202_v42 = vld [vmem:[#allocation2 + $0x1f8] sm:$0xff]  ;;  %v201_v43 = vld [vmem:[#allocation2 + $0x1f0] sm:$0xff]  ;;  %v200_v44 = vld [vmem:[#allocation2 + $0x1e8] sm:$0xff] }
  0x1d   :  { %227 = vmatprep.subr.mxu1 %v158_v22  ;;  %v199_v45 = vld [vmem:[#allocation2 + $0x1e0] sm:$0xff]  ;;  %v198_v46 = vld [vmem:[#allocation2 + $0x1d8] sm:$0xff]  ;;  %v197_v47 = vld [vmem:[#allocation2 + $0x1d0] sm:$0xff] }
  0x1e   :  { %228 = vmatpush1.msra.mxu1 %v157_v23  ;;  %v196_v48 = vld [vmem:[#allocation2 + $0x1c8] sm:$0xff]  ;;  %v195_v49 = vld [vmem:[#allocation2 + $0x1c0] sm:$0xff]  ;;  %v194_v50 = vld [vmem:[#allocation2 + $0x1b8] sm:$0xff] }
  0x1f   :  { %229 = vmatprep.subr.mxu1 %v156_v24  ;;  %v193_v51 = vld [vmem:[#allocation2 + $0x1b0] sm:$0xff]  ;;  %v192_v52 = vld [vmem:[#allocation2 + $0x1a8] sm:$0xff]  ;;  %v191_v53 = vld [vmem:[#allocation2 + $0x1a0] sm:$0xff] }
  0x20   :  { %230 = vmatpush1.msra.mxu1 %v155_v25  ;;  %v190_v54 = vld [vmem:[#allocation2 + $0x198] sm:$0xff]  ;;  %v189_v55 = vld [vmem:[#allocation2 + $0x190] sm:$0xff]  ;;  %v188_v56 = vld [vmem:[#allocation2 + $0x188] sm:$0xff] }
  0x21   :  { %231 = vmatprep.subr.mxu1 %v154_v26  ;;  %v187_v57 = vld [vmem:[#allocation2 + $0x180] sm:$0xff]  ;;  %v186_v58 = vld [vmem:[#allocation2 + $0x178] sm:$0xff]  ;;  %v185_v59 = vld [vmem:[#allocation2 + $0x170] sm:$0xff] }
  0x22   :  { %232 = vmatpush1.msra.mxu1 %v153_v27  ;;  %v184_v60 = vld [vmem:[#allocation2 + $0x168] sm:$0xff]  ;;  %v183_v61 = vld [vmem:[#allocation2 + $0x160] sm:$0xff]  ;;  %v182_v62 = vld [vmem:[#allocation2 + $0x158] sm:$0xff] }
  0x23   :  { %233 = vmatprep.subr.mxu1 %v152_v28  ;;  %v181_v63 = vld [vmem:[#allocation2 + $0x150] sm:$0xff]  ;;  %v180_v0 = vld [vmem:[#allocation2 + $0x148] sm:$0xff]  ;;  %v179_v1 = vld [vmem:[#allocation2 + $0x140] sm:$0xff] }
  0x24   :  { %234 = vmatpush1.msra.mxu1 %v151_v29  ;;  %v178_v2 = vld [vmem:[#allocation2 + $0x138] sm:$0xff]  ;;  %v177_v3 = vld [vmem:[#allocation2 + $0x130] sm:$0xff]  ;;  %v176_v4 = vld [vmem:[#allocation2 + $0x128] sm:$0xff] }
  0x25   :  { %235 = vmatprep.subr.mxu1 %v150_v30  ;;  %v175_v5 = vld [vmem:[#allocation2 + $0x120] sm:$0xff]  ;;  %v174_v6 = vld [vmem:[#allocation2 + $0x118] sm:$0xff]  ;;  %v173_v7 = vld [vmem:[#allocation2 + $0x110] sm:$0xff] }
  0x26   :  { %236 = vmatpush1.msra.mxu1 %v149_v31  ;;  %v172_v8 = vld [vmem:[#allocation2 + $0x108] sm:$0xff]  ;;  %v171_v9 = vld [vmem:[#allocation2 + $0x100] sm:$0xff]  ;;  %v320_v10 = vld [vmem:[#allocation2 + $0x2f8] sm:$0xff] }
  0x27   :  { %237 = vmatprep.subr.mxu1 %v148_v32  ;;  %v319_v11 = vld [vmem:[#allocation2 + $0x2f0] sm:$0xff]  ;;  %v318_v12 = vld [vmem:[#allocation2 + $0x2e8] sm:$0xff]  ;;  %366 = vmatprep.subr.mxu0 %v320_v10  ;;  %v317_v13 = vld [vmem:[#allocation2 + $0x2e0] sm:$0xff] }
  0x28   :  { %238 = vmatpush1.msra.mxu1 %v147_v33  ;;  %367 = vmatpush1.msra.mxu0 %v319_v11  ;;  %v316_v14 = vld [vmem:[#allocation2 + $0x2d8] sm:$0xff]  ;;  %v315_v15 = vld [vmem:[#allocation2 + $0x2d0] sm:$0xff]  ;;  %v314_v16 = vld [vmem:[#allocation2 + $0x2c8] sm:$0xff] }
  0x29   :  { %239 = vmatprep.subr.mxu1 %v146_v34  ;;  %368 = vmatprep.subr.mxu0 %v318_v12  ;;  %v313_v17 = vld [vmem:[#allocation2 + $0x2c0] sm:$0xff]  ;;  %v312_v18 = vld [vmem:[#allocation2 + $0x2b8] sm:$0xff]  ;;  %v311_v19 = vld [vmem:[#allocation2 + $0x2b0] sm:$0xff] }
  0x2a   :  { %240 = vmatpush1.msra.mxu1 %v145_v35  ;;  %369 = vmatpush1.msra.mxu0 %v317_v13  ;;  %v310_v20 = vld [vmem:[#allocation2 + $0x2a8] sm:$0xff]  ;;  %v309_v21 = vld [vmem:[#allocation2 + $0x2a0] sm:$0xff]  ;;  %v308_v22 = vld [vmem:[#allocation2 + $0x298] sm:$0xff] }
  0x2b   :  { %241 = vmatprep.subr.mxu1 %v144_v36  ;;  %370 = vmatprep.subr.mxu0 %v316_v14  ;;  %v307_v23 = vld [vmem:[#allocation2 + $0x290] sm:$0xff]  ;;  %v306_v24 = vld [vmem:[#allocation2 + $0x288] sm:$0xff]  ;;  %v305_v25 = vld [vmem:[#allocation2 + $0x280] sm:$0xff] }
  0x2c   :  { %242 = vmatpush1.msra.mxu1 %v143_v37  ;;  %371 = vmatpush1.msra.mxu0 %v315_v15  ;;  %v304_v26 = vld [vmem:[#allocation2 + $0x278] sm:$0xff]  ;;  %v303_v27 = vld [vmem:[#allocation2 + $0x270] sm:$0xff]  ;;  %v302_v28 = vld [vmem:[#allocation2 + $0x268] sm:$0xff] }
  0x2d   :  { %243 = vmatprep.subr.mxu1 %v142_v38  ;;  %372 = vmatprep.subr.mxu0 %v314_v16  ;;  %v301_v29 = vld [vmem:[#allocation2 + $0x260] sm:$0xff]  ;;  %v300_v30 = vld [vmem:[#allocation2 + $0x258] sm:$0xff]  ;;  %v299_v31 = vld [vmem:[#allocation2 + $0x250] sm:$0xff] }
  0x2e   :  { %244 = vmatpush1.msra.mxu1 %v141_v39  ;;  %373 = vmatpush1.msra.mxu0 %v313_v17  ;;  %v298_v32 = vld [vmem:[#allocation2 + $0x248] sm:$0xff]  ;;  %v297_v33 = vld [vmem:[#allocation2 + $0x240] sm:$0xff]  ;;  %v296_v34 = vld [vmem:[#allocation2 + $0x238] sm:$0xff] }
  0x2f   :  { %245 = vmatprep.subr.mxu1 %v140_v40  ;;  %374 = vmatprep.subr.mxu0 %v312_v18  ;;  %v295_v35 = vld [vmem:[#allocation2 + $0x230] sm:$0xff]  ;;  %v294_v36 = vld [vmem:[#allocation2 + $0x228] sm:$0xff]  ;;  %v293_v37 = vld [vmem:[#allocation2 + $0x220] sm:$0xff] }
  0x30   :  { %246 = vmatpush1.msra.mxu1 %v139_v41  ;;  %375 = vmatpush1.msra.mxu0 %v311_v19  ;;  %v292_v38 = vld [vmem:[#allocation2 + $0x218] sm:$0xff]  ;;  %v291_v39 = vld [vmem:[#allocation2 + $0x210] sm:$0xff]  ;;  %v290_v40 = vld [vmem:[#allocation2 + $0x208] sm:$0xff] }
  0x31   :  { %247 = vmatprep.subr.mxu1 %v202_v42  ;;  %376 = vmatprep.subr.mxu0 %v310_v20  ;;  %v289_v41 = vld [vmem:[#allocation2 + $0x200] sm:$0xff]  ;;  %v352_v42 = vld [vmem:[#allocation2 + $0x3f8] sm:$0xff]  ;;  %v327_v16 = vld [vmem:[#allocation2 + $0x330] sm:$0xff] }
  0x32   :  { %248 = vmatpush2.msra.mxu1 %v201_v43  ;;  %377 = vmatpush1.msra.mxu0 %v309_v21  ;;  %v351_v43 = vld [vmem:[#allocation2 + $0x3f0] sm:$0xff]  ;;  %v328_v15 = vld [vmem:[#allocation2 + $0x338] sm:$0xff]  ;;  %v326_v17 = vld [vmem:[#allocation2 + $0x328] sm:$0xff] }
  0x33   :  { %249 = vmatprep.subr.mxu1 %v200_v44  ;;  %378 = vmatprep.subr.mxu0 %v308_v22  ;;  %v350_v44 = vld [vmem:[#allocation2 + $0x3e8] sm:$0xff]  ;;  %v325_v18 = vld [vmem:[#allocation2 + $0x320] sm:$0xff]  ;;  %v324_v19 = vld [vmem:[#allocation2 + $0x318] sm:$0xff] }
  0x34   :  { %250 = vmatpush2.msra.mxu1 %v199_v45  ;;  %379 = vmatpush1.msra.mxu0 %v307_v23  ;;  %v349_v45 = vld [vmem:[#allocation2 + $0x3e0] sm:$0xff]  ;;  %v323_v20 = vld [vmem:[#allocation2 + $0x310] sm:$0xff]  ;;  %v322_v21 = vld [vmem:[#allocation2 + $0x308] sm:$0xff] }
  0x35   :  { %251 = vmatprep.subr.mxu1 %v198_v46  ;;  %380 = vmatprep.subr.mxu0 %v306_v24  ;;  %v348_v46 = vld [vmem:[#allocation2 + $0x3d8] sm:$0xff]  ;;  %v321_v22 = vld [vmem:[#allocation2 + $0x300] sm:$0xff]  ;;  %v470_v24 = vld [vmem:[#allocation2 + $0x4f0] sm:$0xff] }
  0x36   :  { %252 = vmatpush2.msra.mxu1 %v197_v47  ;;  %381 = vmatpush1.msra.mxu0 %v305_v25  ;;  %v347_v47 = vld [vmem:[#allocation2 + $0x3d0] sm:$0xff]  ;;  %v471_v23 = vld [vmem:[#allocation2 + $0x4f8] sm:$0xff]  ;;  %v469_v25 = vld [vmem:[#allocation2 + $0x4e8] sm:$0xff] }
  0x37   :  { %253 = vmatprep.subr.mxu1 %v196_v48  ;;  %382 = vmatprep.subr.mxu0 %v304_v26  ;;  %v346_v48 = vld [vmem:[#allocation2 + $0x3c8] sm:$0xff]  ;;  %v468_v26 = vld [vmem:[#allocation2 + $0x4e0] sm:$0xff] }
  0x38   :  { %254 = vmatpush2.msra.mxu1 %v195_v49  ;;  %383 = vmatpush1.msra.mxu0 %v303_v27  ;;  %v345_v49 = vld [vmem:[#allocation2 + $0x3c0] sm:$0xff]  ;;  %v467_v27 = vld [vmem:[#allocation2 + $0x4d8] sm:$0xff] }
  0x39   :  { %255 = vmatprep.subr.mxu1 %v194_v50  ;;  %384 = vmatprep.subr.mxu0 %v302_v28  ;;  %v344_v50 = vld [vmem:[#allocation2 + $0x3b8] sm:$0xff]  ;;  %v466_v28 = vld [vmem:[#allocation2 + $0x4d0] sm:$0xff] }
  0x3a   :  { %256 = vmatpush2.msra.mxu1 %v193_v51  ;;  %385 = vmatpush1.msra.mxu0 %v301_v29  ;;  %v343_v51 = vld [vmem:[#allocation2 + $0x3b0] sm:$0xff]  ;;  %v465_v29 = vld [vmem:[#allocation2 + $0x4c8] sm:$0xff] }
  0x3b   :  { %257 = vmatprep.subr.mxu1 %v192_v52  ;;  %386 = vmatprep.subr.mxu0 %v300_v30  ;;  %v342_v52 = vld [vmem:[#allocation2 + $0x3a8] sm:$0xff]  ;;  %v464_v30 = vld [vmem:[#allocation2 + $0x4c0] sm:$0xff] }
  0x3c   :  { %258 = vmatpush2.msra.mxu1 %v191_v53  ;;  %387 = vmatpush1.msra.mxu0 %v299_v31  ;;  %v341_v53 = vld [vmem:[#allocation2 + $0x3a0] sm:$0xff]  ;;  %v463_v31 = vld [vmem:[#allocation2 + $0x4b8] sm:$0xff] }
  0x3d   :  { %259 = vmatprep.subr.mxu1 %v190_v54  ;;  %388 = vmatprep.subr.mxu0 %v298_v32  ;;  %v340_v54 = vld [vmem:[#allocation2 + $0x398] sm:$0xff]  ;;  %v462_v32 = vld [vmem:[#allocation2 + $0x4b0] sm:$0xff] }
  0x3e   :  { %260 = vmatpush2.msra.mxu1 %v189_v55  ;;  %389 = vmatpush1.msra.mxu0 %v297_v33  ;;  %v339_v55 = vld [vmem:[#allocation2 + $0x390] sm:$0xff]  ;;  %v461_v33 = vld [vmem:[#allocation2 + $0x4a8] sm:$0xff] }
  0x3f   :  { %261 = vmatprep.subr.mxu1 %v188_v56  ;;  %390 = vmatprep.subr.mxu0 %v296_v34  ;;  %v338_v56 = vld [vmem:[#allocation2 + $0x388] sm:$0xff]  ;;  %v460_v34 = vld [vmem:[#allocation2 + $0x4a0] sm:$0xff] }
  0x40   :  { %262 = vmatpush2.msra.mxu1 %v187_v57  ;;  %391 = vmatpush1.msra.mxu0 %v295_v35  ;;  %v337_v57 = vld [vmem:[#allocation2 + $0x380] sm:$0xff]  ;;  %v459_v35 = vld [vmem:[#allocation2 + $0x498] sm:$0xff] }
  0x41   :  { %263 = vmatprep.subr.mxu1 %v186_v58  ;;  %392 = vmatprep.subr.mxu0 %v294_v36  ;;  %v336_v58 = vld [vmem:[#allocation2 + $0x378] sm:$0xff]  ;;  %v458_v36 = vld [vmem:[#allocation2 + $0x490] sm:$0xff] }
  0x42   :  { %264 = vmatpush2.msra.mxu1 %v185_v59  ;;  %393 = vmatpush1.msra.mxu0 %v293_v37  ;;  %v335_v59 = vld [vmem:[#allocation2 + $0x370] sm:$0xff]  ;;  %v457_v37 = vld [vmem:[#allocation2 + $0x488] sm:$0xff] }
  0x43   :  { %265 = vmatprep.subr.mxu1 %v184_v60  ;;  %394 = vmatprep.subr.mxu0 %v292_v38  ;;  %v334_v60 = vld [vmem:[#allocation2 + $0x368] sm:$0xff]  ;;  %v456_v38 = vld [vmem:[#allocation2 + $0x480] sm:$0xff] }
  0x44   :  { %266 = vmatpush2.msra.mxu1 %v183_v61  ;;  %395 = vmatpush1.msra.mxu0 %v291_v39  ;;  %v333_v61 = vld [vmem:[#allocation2 + $0x360] sm:$0xff]  ;;  %v455_v39 = vld [vmem:[#allocation2 + $0x478] sm:$0xff] }
  0x45   :  { %267 = vmatprep.subr.mxu1 %v182_v62  ;;  %396 = vmatprep.subr.mxu0 %v290_v40  ;;  %v332_v62 = vld [vmem:[#allocation2 + $0x358] sm:$0xff]  ;;  %v454_v40 = vld [vmem:[#allocation2 + $0x470] sm:$0xff] }
  0x46   :  { %268 = vmatpush2.msra.mxu1 %v181_v63  ;;  %397 = vmatpush1.msra.mxu0 %v289_v41  ;;  %v331_v63 = vld [vmem:[#allocation2 + $0x350] sm:$0xff]  ;;  %v453_v41 = vld [vmem:[#allocation2 + $0x468] sm:$0xff] }
  0x47   :  { %269 = vmatprep.subr.mxu1 %v180_v0  ;;  %398 = vmatprep.subr.mxu0 %v352_v42  ;;  %v330_v0 = vld [vmem:[#allocation2 + $0x348] sm:$0xff]  ;;  %v452_v42 = vld [vmem:[#allocation2 + $0x460] sm:$0xff] }
  0x48   :  { %270 = vmatpush2.msra.mxu1 %v179_v1  ;;  %399 = vmatpush2.msra.mxu0 %v351_v43  ;;  %v329_v1 = vld [vmem:[#allocation2 + $0x340] sm:$0xff]  ;;  %v451_v43 = vld [vmem:[#allocation2 + $0x458] sm:$0xff] }
  0x49   :  { %271 = vmatprep.subr.mxu1 %v178_v2  ;;  %400 = vmatprep.subr.mxu0 %v350_v44  ;;  %v52_v2 = vlaneseq  ;;  %v450_v44 = vld [vmem:[#allocation2 + $0x450] sm:$0xff] }
  0x4a   :  { %272 = vmatpush2.msra.mxu1 %v177_v3  ;;  %401 = vmatpush2.msra.mxu0 %v349_v45  ;;  %v449_v45 = vld [vmem:[#allocation2 + $0x448] sm:$0xff] }
  0x4b   :  { %273 = vmatprep.subr.mxu1 %v176_v4  ;;  %402 = vmatprep.subr.mxu0 %v348_v46  ;;  %v53_v3 = vshrl.u32 %v52_v2, 7  ;;  %v448_v46 = vld [vmem:[#allocation2 + $0x440] sm:$0xff] }
  0x4c   :  { %274 = vmatpush2.msra.mxu1 %v175_v5  ;;  %403 = vmatpush2.msra.mxu0 %v347_v47  ;;  %v50_v5 = vld [vmem:[%s1165_s2] sm:$0x3]  ;;  %v447_v47 = vld [vmem:[#allocation2 + $0x438] sm:$0xff] }
  0x4d   :  { %275 = vmatprep.subr.mxu1 %v174_v6  ;;  %404 = vmatprep.subr.mxu0 %v346_v48  ;;  %v1031_v4 = vsub.s32 0, %v53_v3  ;;  %v1036_v6 = vsub.s32 1, %v53_v3  ;;  %v446_v48 = vld [vmem:[#allocation2 + $0x430] sm:$0xff]  ;;  %v492_v2 = vld [vmem:[#allocation2 + $0x5a0] sm:$0xff]  ;;  %v491_v3 = vld [vmem:[#allocation2 + $0x598] sm:$0xff] }
  0x4e   :  { %276 = vmatpush2.msra.mxu1 %v173_v7  ;;  %405 = vmatpush2.msra.mxu0 %v345_v49  ;;  %v445_v49 = vld [vmem:[#allocation2 + $0x428] sm:$0xff] }
  0x4f   :  { %277 = vmatprep.subr.mxu1 %v172_v8  ;;  %406 = vmatprep.subr.mxu0 %v344_v50  ;;  %v55_v7 = vrot.slane %v50_v5, %v1031_v4  ;;  %v59_v8 = vrot.slane %v50_v5, %v1036_v6  ;;  %v444_v50 = vld [vmem:[#allocation2 + $0x420] sm:$0xff]  ;;  %v490_v5 = vld [vmem:[#allocation2 + $0x590] sm:$0xff] }
  0x50   :  { %278 = vmatpush2.msra.mxu1 %v171_v9  ;;  %407 = vmatpush2.msra.mxu0 %v343_v51  ;;  %v443_v51 = vld [vmem:[#allocation2 + $0x418] sm:$0xff] }
  0x51   :  { %408 = vmatprep.subr.mxu0 %v342_v52  ;;  %517 = vmatprep.subr.mxu1 %v471_v23  ;;  %v442_v52 = vld [vmem:[#allocation2 + $0x410] sm:$0xff] }
  0x52   :  { %409 = vmatpush2.msra.mxu0 %v341_v53  ;;  %v441_v53 = vld [vmem:[#allocation2 + $0x408] sm:$0xff] }
  0x53   :  { %410 = vmatprep.subr.mxu0 %v340_v54  ;;  %v440_v54 = vld [vmem:[#allocation2 + $0x400] sm:$0xff] }
  0x54   :  { %411 = vmatpush2.msra.mxu0 %v339_v55  ;;  %v503_v55 = vld [vmem:[#allocation2 + $0x5f8] sm:$0xff] }
  0x55   :  { %412 = vmatprep.subr.mxu0 %v338_v56  ;;  %v502_v56 = vld [vmem:[#allocation2 + $0x5f0] sm:$0xff] }
  0x56   :  { %413 = vmatpush2.msra.mxu0 %v337_v57  ;;  %v501_v57 = vld [vmem:[#allocation2 + $0x5e8] sm:$0xff] }
  0x57   :  { %414 = vmatprep.subr.mxu0 %v336_v58  ;;  %v500_v58 = vld [vmem:[#allocation2 + $0x5e0] sm:$0xff] }
  0x58   :  { %415 = vmatpush2.msra.mxu0 %v335_v59  ;;  %v499_v59 = vld [vmem:[#allocation2 + $0x5d8] sm:$0xff] }
  0x59   :  { %416 = vmatprep.subr.mxu0 %v334_v60  ;;  %v498_v60 = vld [vmem:[#allocation2 + $0x5d0] sm:$0xff] }
  0x5a   :  { %417 = vmatpush2.msra.mxu0 %v333_v61  ;;  %v497_v61 = vld [vmem:[#allocation2 + $0x5c8] sm:$0xff] }
  0x5b   :  { %418 = vmatprep.subr.mxu0 %v332_v62  ;;  %v496_v62 = vld [vmem:[#allocation2 + $0x5c0] sm:$0xff] }
  0x5c   :  { %419 = vmatpush2.msra.mxu0 %v331_v63  ;;  %v495_v63 = vld [vmem:[#allocation2 + $0x5b8] sm:$0xff] }
  0x5d   :  { %420 = vmatprep.subr.mxu0 %v330_v0  ;;  %v494_v0 = vld [vmem:[#allocation2 + $0x5b0] sm:$0xff] }
  0x5e   :  { %421 = vmatpush2.msra.mxu0 %v329_v1  ;;  %v493_v1 = vld [vmem:[#allocation2 + $0x5a8] sm:$0xff] }
  0x5f   :  { %422 = vmatprep.subr.mxu0 %v328_v15  ;;  %v481_v15 = vld [vmem:[#allocation2 + $0x548] sm:$0xff] }
  0x60   :  { %423 = vmatpush2.msra.mxu0 %v327_v16  ;;  %v480_v16 = vld [vmem:[#allocation2 + $0x540] sm:$0xff] }
  0x61   :  { %424 = vmatprep.subr.mxu0 %v326_v17  ;;  %v203_v17 = vld [vmem:[%s1167_s4] sm:$0x3] }
  0x62   :  { %425 = vmatpush2.msra.mxu0 %v325_v18  ;;  %v208_v18 = vrot.slane %v203_v17, %v1031_v4 }
  0x63   :  { %426 = vmatprep.subr.mxu0 %v324_v19  ;;  %v212_v19 = vrot.slane %v203_v17, %v1036_v6  ;;  %v641_v17 = vld [vmem:[#allocation2 + $0x790] sm:$0xff] }
  0x64   :  { %427 = vmatpush2.msra.mxu0 %v323_v20 }
  0x65   :  { %428 = vmatprep.subr.mxu0 %v322_v21 }
  0x66   :  { %429 = vmatpush2.msra.mxu0 %v321_v22 }
  0xd7   :  { %v132_v9 = vpop.f32.mrf.mxu0 }
  0xd8   :  { %v133_v10 = vadd.f32 %v132_v9, %v55_v7  ;;  %v489_v7 = vld [vmem:[#allocation2 + $0x588] sm:$0xff]  ;;  %v487_v9 = vld [vmem:[#allocation2 + $0x578] sm:$0xff] }
  0xd9   :  { %v134_v11 = vpop.f32.mrf.mxu0 }
  0xda   :  { %v135_v12 = vadd.f32 %v134_v11, %v59_v8  ;;  %v137_v14 = vmax.f32 %v133_v10, 0.0  ;;  %v488_v8 = vld [vmem:[#allocation2 + $0x580] sm:$0xff]  ;;  %v486_v10 = vld [vmem:[#allocation2 + $0x570] sm:$0xff]  ;;  %v485_v11 = vld [vmem:[#allocation2 + $0x568] sm:$0xff] }
  0xdc   :  { %v138_v13 = vmax.f32 %v135_v12, 0.0  ;;  %v484_v12 = vld [vmem:[#allocation2 + $0x560] sm:$0xff] }
  0xde   :  { %279 = vmatprep.mubr.f32.mxu1 %v138_v13  ;;  %v483_v13 = vld [vmem:[#allocation2 + $0x558] sm:$0xff] }
  0xdf   :  { %280 = vmatmul.mubr.f32.vlgmr.msra.gmra.mxu1 %v137_v14  ;;  %v482_v14 = vld [vmem:[#allocation2 + $0x550] sm:$0xff] }
  0xe0   :  { %518 = vmatpush1.msra.mxu1 %v470_v24 }
  0xe1   :  { %519 = vmatprep.subr.mxu1 %v469_v25 }
  0xe2   :  { %520 = vmatpush1.msra.mxu1 %v468_v26  ;;  %v479_v26 = vld [vmem:[#allocation2 + $0x538] sm:$0xff] }
  0xe3   :  { %521 = vmatprep.subr.mxu1 %v467_v27  ;;  %v478_v27 = vld [vmem:[#allocation2 + $0x530] sm:$0xff] }
  0xe4   :  { %522 = vmatpush1.msra.mxu1 %v466_v28  ;;  %v477_v28 = vld [vmem:[#allocation2 + $0x528] sm:$0xff] }
  0xe5   :  { %523 = vmatprep.subr.mxu1 %v465_v29  ;;  %v476_v29 = vld [vmem:[#allocation2 + $0x520] sm:$0xff] }
  0xe6   :  { %524 = vmatpush1.msra.mxu1 %v464_v30  ;;  %v475_v30 = vld [vmem:[#allocation2 + $0x518] sm:$0xff] }
  0xe7   :  { %525 = vmatprep.subr.mxu1 %v463_v31  ;;  %v474_v31 = vld [vmem:[#allocation2 + $0x510] sm:$0xff] }
  0xe8   :  { %526 = vmatpush1.msra.mxu1 %v462_v32  ;;  %v473_v32 = vld [vmem:[#allocation2 + $0x508] sm:$0xff] }
  0xe9   :  { %527 = vmatprep.subr.mxu1 %v461_v33  ;;  %v472_v33 = vld [vmem:[#allocation2 + $0x500] sm:$0xff] }
  0xea   :  { %528 = vmatpush1.msra.mxu1 %v460_v34  ;;  %v622_v34 = vld [vmem:[#allocation2 + $0x6f8] sm:$0xff] }
  0xeb   :  { %529 = vmatprep.subr.mxu1 %v459_v35  ;;  %v621_v35 = vld [vmem:[#allocation2 + $0x6f0] sm:$0xff]  ;;  %668 = vmatprep.subr.mxu0 %v622_v34 }
  0xec   :  { %530 = vmatpush1.msra.mxu1 %v458_v36  ;;  %v620_v36 = vld [vmem:[#allocation2 + $0x6e8] sm:$0xff] }
  0xed   :  { %531 = vmatprep.subr.mxu1 %v457_v37  ;;  %v619_v37 = vld [vmem:[#allocation2 + $0x6e0] sm:$0xff] }
  0xee   :  { %532 = vmatpush1.msra.mxu1 %v456_v38  ;;  %v618_v38 = vld [vmem:[#allocation2 + $0x6d8] sm:$0xff] }
  0xef   :  { %533 = vmatprep.subr.mxu1 %v455_v39  ;;  %v617_v39 = vld [vmem:[#allocation2 + $0x6d0] sm:$0xff] }
  0xf0   :  { %534 = vmatpush1.msra.mxu1 %v454_v40  ;;  %v616_v40 = vld [vmem:[#allocation2 + $0x6c8] sm:$0xff] }
  0xf1   :  { %535 = vmatprep.subr.mxu1 %v453_v41  ;;  %v615_v41 = vld [vmem:[#allocation2 + $0x6c0] sm:$0xff] }
  0xf2   :  { %536 = vmatpush1.msra.mxu1 %v452_v42  ;;  %v614_v42 = vld [vmem:[#allocation2 + $0x6b8] sm:$0xff] }
  0xf3   :  { %537 = vmatprep.subr.mxu1 %v451_v43  ;;  %v613_v43 = vld [vmem:[#allocation2 + $0x6b0] sm:$0xff] }
  0xf4   :  { %538 = vmatpush1.msra.mxu1 %v450_v44  ;;  %v612_v44 = vld [vmem:[#allocation2 + $0x6a8] sm:$0xff] }
  0xf5   :  { %539 = vmatprep.subr.mxu1 %v449_v45  ;;  %v611_v45 = vld [vmem:[#allocation2 + $0x6a0] sm:$0xff] }
  0xf6   :  { %540 = vmatpush1.msra.mxu1 %v448_v46  ;;  %v610_v46 = vld [vmem:[#allocation2 + $0x698] sm:$0xff] }
  0xf7   :  { %541 = vmatprep.subr.mxu1 %v447_v47  ;;  %v609_v47 = vld [vmem:[#allocation2 + $0x690] sm:$0xff] }
  0xf8   :  { %542 = vmatpush1.msra.mxu1 %v446_v48  ;;  %v608_v48 = vld [vmem:[#allocation2 + $0x688] sm:$0xff] }
  0xf9   :  { %543 = vmatprep.subr.mxu1 %v445_v49  ;;  %v607_v49 = vld [vmem:[#allocation2 + $0x680] sm:$0xff] }
  0xfa   :  { %544 = vmatpush1.msra.mxu1 %v444_v50  ;;  %v606_v50 = vld [vmem:[#allocation2 + $0x678] sm:$0xff] }
  0xfb   :  { %545 = vmatprep.subr.mxu1 %v443_v51  ;;  %v605_v51 = vld [vmem:[#allocation2 + $0x670] sm:$0xff] }
  0xfc   :  { %546 = vmatpush1.msra.mxu1 %v442_v52  ;;  %v604_v52 = vld [vmem:[#allocation2 + $0x668] sm:$0xff] }
  0xfd   :  { %547 = vmatprep.subr.mxu1 %v441_v53  ;;  %v603_v53 = vld [vmem:[#allocation2 + $0x660] sm:$0xff] }
  0xfe   :  { %548 = vmatpush1.msra.mxu1 %v440_v54  ;;  %v602_v54 = vld [vmem:[#allocation2 + $0x658] sm:$0xff] }
  0xff   :  { %549 = vmatprep.subr.mxu1 %v503_v55  ;;  %v601_v55 = vld [vmem:[#allocation2 + $0x650] sm:$0xff] }
 0x100   :  { %550 = vmatpush2.msra.mxu1 %v502_v56  ;;  %v600_v56 = vld [vmem:[#allocation2 + $0x648] sm:$0xff] }
 0x101   :  { %551 = vmatprep.subr.mxu1 %v501_v57  ;;  %v599_v57 = vld [vmem:[#allocation2 + $0x640] sm:$0xff] }
 0x102   :  { %552 = vmatpush2.msra.mxu1 %v500_v58  ;;  %v598_v58 = vld [vmem:[#allocation2 + $0x638] sm:$0xff] }
 0x103   :  { %553 = vmatprep.subr.mxu1 %v499_v59  ;;  %v597_v59 = vld [vmem:[#allocation2 + $0x630] sm:$0xff] }
 0x104   :  { %554 = vmatpush2.msra.mxu1 %v498_v60  ;;  %v596_v60 = vld [vmem:[#allocation2 + $0x628] sm:$0xff] }
 0x105   :  { %555 = vmatprep.subr.mxu1 %v497_v61  ;;  %v595_v61 = vld [vmem:[#allocation2 + $0x620] sm:$0xff] }
 0x106   :  { %556 = vmatpush2.msra.mxu1 %v496_v62  ;;  %v594_v62 = vld [vmem:[#allocation2 + $0x618] sm:$0xff] }
 0x107   :  { %557 = vmatprep.subr.mxu1 %v495_v63  ;;  %v593_v63 = vld [vmem:[#allocation2 + $0x610] sm:$0xff] }
 0x108   :  { %558 = vmatpush2.msra.mxu1 %v494_v0  ;;  %v592_v0 = vld [vmem:[#allocation2 + $0x608] sm:$0xff] }
 0x109   :  { %559 = vmatprep.subr.mxu1 %v493_v1  ;;  %v591_v1 = vld [vmem:[#allocation2 + $0x600] sm:$0xff] }
 0x10a   :  { %560 = vmatpush2.msra.mxu1 %v492_v2  ;;  %v654_v2 = vld [vmem:[#allocation2 + $0x7f8] sm:$0xff] }
 0x10b   :  { %561 = vmatprep.subr.mxu1 %v491_v3  ;;  %v653_v3 = vld [vmem:[#allocation2 + $0x7f0] sm:$0xff] }
 0x10c   :  { %562 = vmatpush2.msra.mxu1 %v490_v5  ;;  %v652_v5 = vld [vmem:[#allocation2 + $0x7e8] sm:$0xff] }
 0x10d   :  { %563 = vmatprep.subr.mxu1 %v489_v7  ;;  %v651_v7 = vld [vmem:[#allocation2 + $0x7e0] sm:$0xff] }
 0x10e   :  { %564 = vmatpush2.msra.mxu1 %v488_v8  ;;  %v650_v8 = vld [vmem:[#allocation2 + $0x7d8] sm:$0xff] }
 0x10f   :  { %565 = vmatprep.subr.mxu1 %v487_v9  ;;  %v649_v9 = vld [vmem:[#allocation2 + $0x7d0] sm:$0xff] }
 0x110   :  { %566 = vmatpush2.msra.mxu1 %v486_v10  ;;  %v648_v10 = vld [vmem:[#allocation2 + $0x7c8] sm:$0xff] }
 0x111   :  { %567 = vmatprep.subr.mxu1 %v485_v11  ;;  %v647_v11 = vld [vmem:[#allocation2 + $0x7c0] sm:$0xff] }
 0x112   :  { %568 = vmatpush2.msra.mxu1 %v484_v12  ;;  %v646_v12 = vld [vmem:[#allocation2 + $0x7b8] sm:$0xff] }
 0x113   :  { %569 = vmatprep.subr.mxu1 %v483_v13  ;;  %v645_v13 = vld [vmem:[#allocation2 + $0x7b0] sm:$0xff] }
 0x114   :  { %570 = vmatpush2.msra.mxu1 %v482_v14  ;;  %v644_v14 = vld [vmem:[#allocation2 + $0x7a8] sm:$0xff] }
 0x115   :  { %571 = vmatprep.subr.mxu1 %v481_v15  ;;  %v643_v15 = vld [vmem:[#allocation2 + $0x7a0] sm:$0xff] }
 0x116   :  { %572 = vmatpush2.msra.mxu1 %v480_v16  ;;  %v642_v16 = vld [vmem:[#allocation2 + $0x798] sm:$0xff] }
 0x117   :  { %573 = vmatprep.subr.mxu1 %v479_v26  ;;  %v632_v26 = vld [vmem:[#allocation2 + $0x748] sm:$0xff] }
 0x118   :  { %574 = vmatpush2.msra.mxu1 %v478_v27  ;;  %v631_v27 = vld [vmem:[#allocation2 + $0x740] sm:$0xff] }
 0x119   :  { %575 = vmatprep.subr.mxu1 %v477_v28  ;;  %v867_v28 = vld [vmem:[%s1167_s4 + $0x2] sm:$0x3] }
 0x11a   :  { %576 = vmatpush2.msra.mxu1 %v476_v29  ;;  %v359_v29 = vrot.slane %v867_v28, %v1031_v4 }
 0x11b   :  { %577 = vmatprep.subr.mxu1 %v475_v30  ;;  %v363_v30 = vrot.slane %v867_v28, %v1036_v6 }
 0x11c   :  { %578 = vmatpush2.msra.mxu1 %v474_v31 }
 0x11d   :  { %579 = vmatprep.subr.mxu1 %v473_v32 }
 0x11e   :  { %580 = vmatpush2.msra.mxu1 %v472_v33 }
 0x19f   :  { %v281_v20 = vpop.f32.mrf.mxu1 }
 0x1a0   :  { %v282_v21 = vadd.f32 %v281_v20, %v208_v18  ;;  %v640_v18 = vld [vmem:[#allocation2 + $0x788] sm:$0xff]  ;;  %v638_v20 = vld [vmem:[#allocation2 + $0x778] sm:$0xff] }
 0x1a1   :  { %v283_v22 = vpop.f32.mrf.mxu1 }
 0x1a2   :  { %v284_v23 = vadd.f32 %v283_v22, %v212_v19  ;;  %v286_v25 = vmax.f32 %v282_v21, 0.0  ;;  %v639_v19 = vld [vmem:[#allocation2 + $0x780] sm:$0xff]  ;;  %v637_v21 = vld [vmem:[#allocation2 + $0x770] sm:$0xff]  ;;  %v636_v22 = vld [vmem:[#allocation2 + $0x768] sm:$0xff] }
 0x1a4   :  { %v287_v24 = vmax.f32 %v284_v23, 0.0  ;;  %v635_v23 = vld [vmem:[#allocation2 + $0x760] sm:$0xff] }
 0x1a6   :  { %430 = vmatprep.mubr.f32.mxu0 %v287_v24  ;;  %v634_v24 = vld [vmem:[#allocation2 + $0x758] sm:$0xff] }
 0x1a7   :  { %431 = vmatmul.mubr.f32.vlgmr.msra.gmra.mxu0 %v286_v25  ;;  %v633_v25 = vld [vmem:[#allocation2 + $0x750] sm:$0xff] }
 0x1a8   :  { %669 = vmatpush1.msra.mxu0 %v621_v35 }
 0x1a9   :  { %670 = vmatprep.subr.mxu0 %v620_v36 }
 0x1aa   :  { %671 = vmatpush1.msra.mxu0 %v619_v37  ;;  %v630_v37 = vld [vmem:[#allocation2 + $0x738] sm:$0xff] }
 0x1ab   :  { %672 = vmatprep.subr.mxu0 %v618_v38  ;;  %v629_v38 = vld [vmem:[#allocation2 + $0x730] sm:$0xff] }
 0x1ac   :  { %673 = vmatpush1.msra.mxu0 %v617_v39  ;;  %v628_v39 = vld [vmem:[#allocation2 + $0x728] sm:$0xff] }
 0x1ad   :  { %674 = vmatprep.subr.mxu0 %v616_v40  ;;  %v627_v40 = vld [vmem:[#allocation2 + $0x720] sm:$0xff] }
 0x1ae   :  { %675 = vmatpush1.msra.mxu0 %v615_v41  ;;  %v626_v41 = vld [vmem:[#allocation2 + $0x718] sm:$0xff] }
 0x1af   :  { %676 = vmatprep.subr.mxu0 %v614_v42  ;;  %v625_v42 = vld [vmem:[#allocation2 + $0x710] sm:$0xff] }
 0x1b0   :  { %677 = vmatpush1.msra.mxu0 %v613_v43  ;;  %v624_v43 = vld [vmem:[#allocation2 + $0x708] sm:$0xff] }
 0x1b1   :  { %678 = vmatprep.subr.mxu0 %v612_v44  ;;  %v623_v44 = vld [vmem:[#allocation2 + $0x700] sm:$0xff] }
 0x1b2   :  { %679 = vmatpush1.msra.mxu0 %v611_v45  ;;  %v772_v45 = vld [vmem:[%s1168_s5 + $0xf8] sm:$0xff] }
 0x1b3   :  { %680 = vmatprep.subr.mxu0 %v610_v46  ;;  %v756_v46 = vld [vmem:[%s1168_s5 + $0x78] sm:$0xff]  ;;  %871 = vmatprep.subr.mxu1 %v772_v45 }
 0x1b4   :  { %681 = vmatpush1.msra.mxu0 %v609_v47  ;;  %v771_v47 = vld [vmem:[%s1168_s5 + $0xf0] sm:$0xff] }
 0x1b5   :  { %682 = vmatprep.subr.mxu0 %v608_v48  ;;  %v755_v48 = vld [vmem:[%s1168_s5 + $0x70] sm:$0xff] }
 0x1b6   :  { %683 = vmatpush1.msra.mxu0 %v607_v49  ;;  %v770_v49 = vld [vmem:[%s1168_s5 + $0xe8] sm:$0xff] }
 0x1b7   :  { %684 = vmatprep.subr.mxu0 %v606_v50  ;;  %v754_v50 = vld [vmem:[%s1168_s5 + $0x68] sm:$0xff] }
 0x1b8   :  { %685 = vmatpush1.msra.mxu0 %v605_v51  ;;  %v769_v51 = vld [vmem:[%s1168_s5 + $0xe0] sm:$0xff] }
 0x1b9   :  { %686 = vmatprep.subr.mxu0 %v604_v52  ;;  %v753_v52 = vld [vmem:[%s1168_s5 + $0x60] sm:$0xff] }
 0x1ba   :  { %687 = vmatpush1.msra.mxu0 %v603_v53  ;;  %v768_v53 = vld [vmem:[%s1168_s5 + $0xd8] sm:$0xff] }
 0x1bb   :  { %688 = vmatprep.subr.mxu0 %v602_v54  ;;  %v752_v54 = vld [vmem:[%s1168_s5 + $0x58] sm:$0xff] }
 0x1bc   :  { %689 = vmatpush1.msra.mxu0 %v601_v55  ;;  %v767_v55 = vld [vmem:[%s1168_s5 + $0xd0] sm:$0xff] }
 0x1bd   :  { %690 = vmatprep.subr.mxu0 %v600_v56  ;;  %v751_v56 = vld [vmem:[%s1168_s5 + $0x50] sm:$0xff] }
 0x1be   :  { %691 = vmatpush1.msra.mxu0 %v599_v57  ;;  %v766_v57 = vld [vmem:[%s1168_s5 + $0xc8] sm:$0xff] }
 0x1bf   :  { %692 = vmatprep.subr.mxu0 %v598_v58  ;;  %v750_v58 = vld [vmem:[%s1168_s5 + $0x48] sm:$0xff] }
 0x1c0   :  { %693 = vmatpush1.msra.mxu0 %v597_v59  ;;  %v765_v59 = vld [vmem:[%s1168_s5 + $0xc0] sm:$0xff] }
 0x1c1   :  { %694 = vmatprep.subr.mxu0 %v596_v60  ;;  %v749_v60 = vld [vmem:[%s1168_s5 + $0x40] sm:$0xff] }
 0x1c2   :  { %695 = vmatpush1.msra.mxu0 %v595_v61  ;;  %v764_v61 = vld [vmem:[%s1168_s5 + $0xb8] sm:$0xff] }
 0x1c3   :  { %696 = vmatprep.subr.mxu0 %v594_v62  ;;  %v748_v62 = vld [vmem:[%s1168_s5 + $0x38] sm:$0xff] }
 0x1c4   :  { %697 = vmatpush1.msra.mxu0 %v593_v63  ;;  %v763_v63 = vld [vmem:[%s1168_s5 + $0xb0] sm:$0xff] }
 0x1c5   :  { %698 = vmatprep.subr.mxu0 %v592_v0  ;;  %v747_v0 = vld [vmem:[%s1168_s5 + $0x30] sm:$0xff] }
 0x1c6   :  { %699 = vmatpush1.msra.mxu0 %v591_v1  ;;  %v762_v1 = vld [vmem:[%s1168_s5 + $0xa8] sm:$0xff] }
 0x1c7   :  { %700 = vmatprep.subr.mxu0 %v654_v2  ;;  %v746_v2 = vld [vmem:[%s1168_s5 + $0x28] sm:$0xff] }
 0x1c8   :  { %701 = vmatpush2.msra.mxu0 %v653_v3  ;;  %v761_v3 = vld [vmem:[%s1168_s5 + $0xa0] sm:$0xff] }
 0x1c9   :  { %702 = vmatprep.subr.mxu0 %v652_v5  ;;  %v745_v5 = vld [vmem:[%s1168_s5 + $0x20] sm:$0xff] }
 0x1ca   :  { %703 = vmatpush2.msra.mxu0 %v651_v7  ;;  %v868_v7 = vld [vmem:[%s1167_s4 + $0x4] sm:$0x3] }
 0x1cb   :  { %704 = vmatprep.subr.mxu0 %v650_v8  ;;  %v510_v8 = vrot.slane %v868_v7, %v1031_v4 }
 0x1cc   :  { %705 = vmatpush2.msra.mxu0 %v649_v9  ;;  %v514_v9 = vrot.slane %v868_v7, %v1036_v6 }
 0x1cd   :  { %706 = vmatprep.subr.mxu0 %v648_v10 }
 0x1ce   :  { %707 = vmatpush2.msra.mxu0 %v647_v11 }
 0x1cf   :  { %708 = vmatprep.subr.mxu0 %v646_v12 }
 0x1d0   :  { %709 = vmatpush2.msra.mxu0 %v645_v13 }
 0x1d1   :  { %710 = vmatprep.subr.mxu0 %v644_v14 }
 0x1d2   :  { %711 = vmatpush2.msra.mxu0 %v643_v15 }
 0x1d3   :  { %712 = vmatprep.subr.mxu0 %v642_v16  ;;  %v760_v16 = vld [vmem:[%s1168_s5 + $0x98] sm:$0xff] }
 0x1d4   :  { %713 = vmatpush2.msra.mxu0 %v641_v17  ;;  %v744_v17 = vld [vmem:[%s1168_s5 + $0x18] sm:$0xff] }
 0x1d5   :  { %714 = vmatprep.subr.mxu0 %v640_v18  ;;  %v759_v18 = vld [vmem:[%s1168_s5 + $0x90] sm:$0xff] }
 0x1d6   :  { %715 = vmatpush2.msra.mxu0 %v639_v19  ;;  %v743_v19 = vld [vmem:[%s1168_s5 + $0x10] sm:$0xff] }
 0x1d7   :  { %716 = vmatprep.subr.mxu0 %v638_v20  ;;  %v758_v20 = vld [vmem:[%s1168_s5 + $0x88] sm:$0xff] }
 0x1d8   :  { %717 = vmatpush2.msra.mxu0 %v637_v21  ;;  %v742_v21 = vld [vmem:[%s1168_s5 + $0x8] sm:$0xff] }
 0x1d9   :  { %718 = vmatprep.subr.mxu0 %v636_v22  ;;  %v757_v22 = vld [vmem:[%s1168_s5 + $0x80] sm:$0xff] }
 0x1da   :  { %719 = vmatpush2.msra.mxu0 %v635_v23  ;;  %v741_v23 = vld [vmem:[%s1168_s5] sm:$0xff] }
 0x1db   :  { %720 = vmatprep.subr.mxu0 %v634_v24  ;;  %v869_v24 = vld [vmem:[%s1167_s4 + $0x6] sm:$0x3]  ;;  %s857_s4 = sshll.u32 %s959_s19, 4  ;;  %s858_s4 = int_to_ptr.vmem [resolvable:$true] %s857_s4 }
 0x1dc   :  { %721 = vmatpush2.msra.mxu0 %v633_v25  ;;  %v661_v25 = vrot.slane %v869_v24, %v1031_v4  ;;  %s931_s20 = scalar_lea.vmem %s858_s4, 128  ;;  %p936_p6 = scmp.lt.s32.totalorder %s858_s4, %s858_s4 }
 0x1dd   :  { %722 = vmatprep.subr.mxu0 %v632_v26  ;;  %v665_v26 = vrot.slane %v869_v24, %v1036_v6  ;;  %p932_p5 = scmp.ne.s32.totalorder %s858_s4, %s931_s20  ;;  %p937_p7 = scmp.lt.s32.totalorder %s931_s20, %s931_s20 }
 0x1de   :  { %723 = vmatpush2.msra.mxu0 %v631_v27 }
 0x1df   :  { %724 = vmatprep.subr.mxu0 %v630_v37  ;;  %p938_p8 = por %p937_p7, %p936_p6 }
 0x1e0   :  { %725 = vmatpush2.msra.mxu0 %v629_v38 }
 0x1e1   :  { %726 = vmatprep.subr.mxu0 %v628_v39  ;;  %p939_p9 = pnand %p938_p8, %p932_p5 }
 0x1e2   :  { %727 = vmatpush2.msra.mxu0 %v627_v40 }
 0x1e3   :  { %728 = vmatprep.subr.mxu0 %v626_v41 }
 0x1e4   :  { %729 = vmatpush2.msra.mxu0 %v625_v42 }
 0x1e5   :  { %730 = vmatprep.subr.mxu0 %v624_v43 }
 0x1e6   :  { %731 = vmatpush2.msra.mxu0 %v623_v44 }
 0x267   :  { %v432_v31 = vpop.f32.mrf.mxu0 }
 0x268   :  { %v433_v32 = vadd.f32 %v432_v31, %v359_v29 }
 0x269   :  { %v434_v33 = vpop.f32.mrf.mxu0 }
 0x26a   :  { %v435_v34 = vadd.f32 %v434_v33, %v363_v30  ;;  %v437_v36 = vmax.f32 %v433_v32, 0.0 }
 0x26c   :  { %v438_v35 = vmax.f32 %v435_v34, 0.0  ;;  %v870_v34 = vld [vmem:[%s1169_s6] ss:$0 sm:$0xff] }
 0x26e   :  { %581 = vmatprep.mubr.f32.mxu1 %v438_v35 }
 0x26f   :  { %582 = vmatmul.mubr.f32.vlgmr.msra.gmra.mxu1 %v437_v36 }
 0x270   :  { %872 = vmatpush3.msra.mxu1 %v756_v46 }
 0x271   :  { %873 = vmatprep.subr.mxu1 %v771_v47 }
 0x272   :  { %874 = vmatpush3.msra.mxu1 %v755_v48 }
 0x273   :  { %875 = vmatprep.subr.mxu1 %v770_v49 }
 0x274   :  { %876 = vmatpush3.msra.mxu1 %v754_v50 }
 0x275   :  { %877 = vmatprep.subr.mxu1 %v769_v51 }
 0x276   :  { %878 = vmatpush3.msra.mxu1 %v753_v52 }
 0x277   :  { %879 = vmatprep.subr.mxu1 %v768_v53 }
 0x278   :  { %880 = vmatpush3.msra.mxu1 %v752_v54 }
 0x279   :  { %881 = vmatprep.subr.mxu1 %v767_v55 }
 0x27a   :  { %882 = vmatpush3.msra.mxu1 %v751_v56 }
 0x27b   :  { %883 = vmatprep.subr.mxu1 %v766_v57 }
 0x27c   :  { %884 = vmatpush3.msra.mxu1 %v750_v58 }
 0x27d   :  { %885 = vmatprep.subr.mxu1 %v765_v59 }
 0x27e   :  { %886 = vmatpush3.msra.mxu1 %v749_v60 }
 0x27f   :  { %887 = vmatprep.subr.mxu1 %v764_v61 }
 0x280   :  { %888 = vmatpush3.msra.mxu1 %v748_v62 }
 0x281   :  { %889 = vmatprep.subr.mxu1 %v763_v63 }
 0x282   :  { %890 = vmatpush3.msra.mxu1 %v747_v0 }
 0x283   :  { %891 = vmatprep.subr.mxu1 %v762_v1 }
 0x284   :  { %892 = vmatpush3.msra.mxu1 %v746_v2 }
 0x285   :  { %893 = vmatprep.subr.mxu1 %v761_v3 }
 0x286   :  { %894 = vmatpush3.msra.mxu1 %v745_v5 }
 0x287   :  { %895 = vmatprep.subr.mxu1 %v760_v16 }
 0x288   :  { %896 = vmatpush3.msra.mxu1 %v744_v17 }
 0x289   :  { %897 = vmatprep.subr.mxu1 %v759_v18 }
 0x28a   :  { %898 = vmatpush3.msra.mxu1 %v743_v19 }
 0x28b   :  { %899 = vmatprep.subr.mxu1 %v758_v20 }
 0x28c   :  { %900 = vmatpush3.msra.mxu1 %v742_v21 }
 0x28d   :  { %901 = vmatprep.subr.mxu1 %v757_v22 }
 0x28e   :  { %902 = vmatpush3.msra.mxu1 %v741_v23 }
 0x32f   :  { %v583_v10 = vpop.f32.mrf.mxu1 }
 0x330   :  { %v584_v11 = vadd.f32 %v583_v10, %v510_v8 }
 0x331   :  { %v585_v12 = vpop.f32.mrf.mxu1 }
 0x332   :  { %v586_v13 = vadd.f32 %v585_v12, %v514_v9  ;;  %v588_v15 = vmax.f32 %v584_v11, 0.0 }
 0x334   :  { %v589_v14 = vmax.f32 %v586_v13, 0.0 }
 0x336   :  { %732 = vmatprep.mubr.f32.mxu0 %v589_v14 }
 0x337   :  { %733 = vmatmul.mubr.f32.vlgmr.msra.gmra.mxu0 %v588_v15 }
 0x3f7   :  { %v734_v27 = vpop.f32.mrf.mxu0 }
 0x3f8   :  { %v735_v28 = vadd.f32 %v734_v27, %v661_v25 }
 0x3f9   :  { %v736_v29 = vpop.f32.mrf.mxu0 }
 0x3fa   :  { %v737_v30 = vadd.f32 %v736_v29, %v665_v26  ;;  %v739_v32 = vmax.f32 %v735_v28, 0.0 }
 0x3fc   :  { %v740_v31 = vmax.f32 %v737_v30, 0.0 }
 0x3fe   :  { %844 = vmatprep.mubr.f32.mxu1 %v740_v31 }
 0x3ff   :  { %845 = vmatmul.mubr.f32.vlgmr.msra.gmra.mxu1 %v739_v32 }
 0x4bf   :  { %v903_v33 = vpop.f32.mrf.mxu1 }
 0x4c1   :  { %v904_v35 = vpop.f32.mrf.mxu1 }
 0x4c2   :  { %v905_v36 = vadd.f32 %v904_v35, %v903_v33 }
 0x4c4   :  { %v847_v4 = vadd.f32 %v905_v36, %v870_v34 }
 0x4c6   :  { %850 = vst.msk [vmem:[#allocation5] sm:$0xff] %vm62_vm0, %v847_v4 }
 0x4c7   :  { %942 = shalt.err (!%p939_p9)
}
 0x4c8   :  { %860 = dma.vmem_to_hbm [thread:$0]  %s858_s4, 128, %s1170_s7, [#allocation4]  }
 0x4c9   :  { %953 = dma.done.wait [#allocation4], 128  }
 0x4ca   :  { %954 = vsyncadd [#allocation4], 4294967168 }
 0x4cb   :  { %864 = vsyncpa [#allocation3], 1 }
 0x4cc   :  { %865 = vsyncpa [#allocation4], 1 }

</bundles_post_ra>
